<compile_context>
chip_gen: v5e
topology: v5e:2x2
jax: 0.10.0
libtpu: 0.0.40
codegen_flags: <defaults>
</compile_context>

<pallas_src>
import functools

import jax
import jax.numpy as jnp
from jax import lax
from jax.experimental import pallas as pl
from jax.experimental.pallas import tpu as pltpu


def _round_up(x, m):
    return ((x + m - 1) // m) * m


def _supcon_kernel(a_ref, c_ref, lab_r_ref, lab_c_ref, out_ref, *,
                   inv_temp, n_valid):
    # a_ref    : [TM, D]     f32  anchor rows for this block
    # c_ref    : [Nc, D]     f32  all contrast rows (resident across steps)
    # lab_r_ref: [TM, 1]     i32  labels of the anchor rows
    # lab_c_ref: [1, Nc]     i32  labels of all contrast rows
    # out_ref  : [1, 8, 128] f32  block partial sum (broadcast over the tile)
    i = pl.program_id(0)
    a = a_ref[...] * inv_temp            # fold 1/temperature into [TM, D]
    c = c_ref[...]
    tm = a.shape[0]
    nc = c.shape[0]

    # (A/T) @ C.T, contraction on D -> no explicit transpose, f32 accumulate.
    logits = lax.dot_general(
        a, c, (((1,), (1,)), ((), ())),
        preferred_element_type=jnp.float32)                      # [TM, Nc]

    # Global row / column indices -> diagonal + padding masks built in-kernel.
    gr = i * tm + lax.broadcasted_iota(jnp.int32, (tm, 1), 0)    # [TM, 1]
    gc = lax.broadcasted_iota(jnp.int32, (1, nc), 1)             # [1, Nc]
    col_valid = gc < n_valid                                     # [1, Nc]
    lmask = jnp.where(col_valid & (gr != gc), 1.0, 0.0)          # [TM, Nc]

    # Row-wise max over the *real* columns (matches torch.max incl. diagonal).
    lmax = jnp.max(jnp.where(col_valid, logits, -1e30),
                   axis=1, keepdims=True)                        # [TM, 1]
    l = logits - lmax                                            # [TM, Nc]

    exp_l = jnp.exp(l) * lmask
    denom = jnp.sum(exp_l, axis=1, keepdims=True) + 0.001        # [TM, 1]

    # Positive mask regenerated from labels (no [N, N] mask DMA).
    pos = jnp.where(lab_r_ref[...] == lab_c_ref[...], 1.0, 0.0) * lmask
    pos_cnt = jnp.sum(pos, axis=1, keepdims=True)                # [TM, 1]
    pos_dot = jnp.sum(pos * l, axis=1, keepdims=True)            # [TM, 1]

    # Fused: sum_j m*log_prob = sum_j m*l - (sum_j m) * log(denom)
    mean_lp = (pos_dot - pos_cnt * jnp.log(denom)) / (pos_cnt + 0.001)

    row_valid = gr < n_valid                                     # [TM, 1]
    block_sum = jnp.sum(jnp.where(row_valid, mean_lp, 0.0))      # scalar
    out_ref[...] = jnp.broadcast_to(block_sum, out_ref.shape)


def supcon_loss(features, labels=None, mask=None,
                temperature=0.07, contrast_mode='all',
                base_temperature=0.07, block_rows=128):
    """features: [bsz, n_views, ...] -> scalar loss (float32)."""
    if features.ndim < 3:
        raise ValueError('`features` needs to be [bsz, n_views, ...]')
    if contrast_mode != 'all':
        raise NotImplementedError('only contrast_mode="all" is implemented')
    if labels is not None and mask is not None:
        raise ValueError('Cannot define both `labels` and `mask`')
    if mask is not None:
        raise NotImplementedError('explicit `mask` path not implemented')

    bsz, n_views = features.shape[0], features.shape[1]
    feats = features.reshape(bsz, n_views, -1).astype(jnp.float32)
    dim = feats.shape[-1]

    if labels is None:
        lab = jnp.arange(bsz, dtype=jnp.int32)   # eye mask == distinct pseudo-labels
    else:
        lab = labels.reshape(-1).astype(jnp.int32)
        if lab.shape[0] != bsz:
            raise ValueError('Num of labels does not match num of features')

    # contrast_feature = torch.cat(torch.unbind(features, dim=1), dim=0)
    cf = jnp.transpose(feats, (1, 0, 2)).reshape(n_views * bsz, dim)
    lab_full = jnp.tile(lab, n_views)            # [N]

    N = n_views * bsz

    # Row tiling: TM rows per grid step, rows padded only to a multiple of TM.
    TM = min(int(block_rows), _round_up(N, 8))
    n_rows_pad = _round_up(N, TM)
    n_blk = n_rows_pad // TM

    # Column (contrast) padding: keep [TM, Nc] logits lane-dense (128 lanes).
    n_cols_pad = _round_up(N, 128)

    a_p = jnp.pad(cf, ((0, n_rows_pad - N), (0, 0)))             # anchors
    c_p = jnp.pad(cf, ((0, n_cols_pad - N), (0, 0)))             # contrast set
    lab_row = jnp.pad(lab_full, (0, n_rows_pad - N),
                      constant_values=-1).reshape(n_rows_pad, 1)
    lab_col = jnp.pad(lab_full, (0, n_cols_pad - N),
                      constant_values=-1).reshape(1, n_cols_pad)

    kernel = functools.partial(
        _supcon_kernel, inv_temp=float(1.0 / temperature), n_valid=N)

    # Rough per-step working-set estimate; cap below v7x's 64 MiB physical VMEM.
    est = 4 * (2 * TM * dim + 2 * n_cols_pad * dim
               + 6 * TM * n_cols_pad) + (1 << 20)
    vmem_limit = int(min(max(est, 16 * 1024 * 1024), 40 * 1024 * 1024))

    out = pl.pallas_call(
        kernel,
        out_shape=jax.ShapeDtypeStruct((n_blk, 8, 128), jnp.float32),
        grid_spec=pltpu.PrefetchScalarGridSpec(
            num_scalar_prefetch=0,
            grid=(n_blk,),
            in_specs=[
                pl.BlockSpec((TM, dim), lambda i: (i, 0)),          # anchor row tile
                pl.BlockSpec((n_cols_pad, dim), lambda i: (0, 0)),  # full contrast (resident)
                pl.BlockSpec((TM, 1), lambda i: (i, 0)),            # row labels tile
                pl.BlockSpec((1, n_cols_pad), lambda i: (0, 0)),    # all column labels
            ],
            out_specs=pl.BlockSpec((1, 8, 128), lambda i: (i, 0, 0)),
        ),
        compiler_params=pltpu.CompilerParams(
            dimension_semantics=("parallel",),
            vmem_limit_bytes=vmem_limit),
    )(a_p, c_p, lab_row, lab_col)

    total = jnp.sum(out[:, 0, 0])
    return -(temperature / base_temperature) * total / N


def _supcon_loss_ref(features, labels, temperature=0.07, base_temperature=0.07):
    """Pure-JAX reference mirroring the PyTorch forward (mode='all')."""
    bsz, n_views = features.shape[0], features.shape[1]
    feats = features.reshape(bsz, n_views, -1).astype(jnp.float32)
    labels = labels.reshape(-1, 1)
    base_mask = (labels == labels.T).astype(jnp.float32)
    cf = jnp.transpose(feats, (1, 0, 2)).reshape(n_views * bsz, -1)
    adc = jnp.matmul(cf, cf.T, precision=lax.Precision.HIGHEST) / temperature
    logits = adc - jnp.max(adc, axis=1, keepdims=True)
    m = jnp.tile(base_mask, (n_views, n_views))
    lm = 1.0 - jnp.eye(n_views * bsz, dtype=jnp.float32)
    m = m * lm
    exp_logits = jnp.exp(logits) * lm
    log_prob = logits - jnp.log(exp_logits.sum(1, keepdims=True) + 0.001)
    mlpp = (m * log_prob).sum(1) / (m.sum(1) + 0.001)
    return jnp.mean(-(temperature / base_temperature) * mlpp)


if __name__ == "__main__":
    key = jax.random.PRNGKey(0)
    kf, kl = jax.random.split(key)

    bsz, n_views, dim = 8, 2, 32
    features = jax.random.normal(kf, (bsz, n_views, dim), dtype=jnp.float32)
    # L2-normalize along feature dim (typical SupCon usage; forward works either way)
    features = features / jnp.linalg.norm(features, axis=-1, keepdims=True)
    labels = jax.random.randint(kl, (bsz,), 0, 3, dtype=jnp.int32)

    loss = supcon_loss(features, labels=labels)
    loss = jax.block_until_ready(loss)

    ref = jax.block_until_ready(_supcon_loss_ref(features, labels))
    assert jnp.allclose(loss, ref, rtol=1e-4, atol=1e-4), (loss, ref)

    # Also exercise the default (labels=None -> eye mask) path.
    loss_eye = jax.block_until_ready(supcon_loss(features))
    ref_eye = jax.block_until_ready(
        _supcon_loss_ref(features, jnp.arange(bsz, dtype=jnp.int32)))
    assert jnp.allclose(loss_eye, ref_eye, rtol=1e-4, atol=1e-4), (loss_eye, ref_eye)

    print("KERNEL_OK")
</pallas_src>

<mosaic_0001>
module attributes {stable_mosaic.version = 11 : i64} {
  func.func @_supcon_kernel(%arg0: i32, %arg1: memref<16x32xf32, #tpu.memory_space<vmem>>, %arg2: memref<128x32xf32, #tpu.memory_space<vmem>>, %arg3: memref<16x1xi32, #tpu.memory_space<vmem>>, %arg4: memref<1x128xi32, #tpu.memory_space<vmem>>, %arg5: memref<1x8x128xf32, #tpu.memory_space<vmem>>) attributes {dimension_semantics = [#tpu.dimension_semantics<parallel>], iteration_bounds = array<i64: 1>, scalar_prefetch = 0 : i64, scratch_operands = 0 : i64, tpu.core_type = #tpu.core_type<tc>, window_params = [{transform_indices = @transform_0, window_bounds = array<i64: 16, 32>}, {pipeline_mode = #tpu.pipeline_mode<synchronous>, transform_indices = @transform_1, window_bounds = array<i64: 128, 32>}, {transform_indices = @transform_2, window_bounds = array<i64: 16, 1>}, {pipeline_mode = #tpu.pipeline_mode<synchronous>, transform_indices = @transform_3, window_bounds = array<i64: 1, 128>}, {transform_indices = @transform_4, window_bounds = array<i64: 1, 8, 128>}]} {
    %c0 = arith.constant 0 : index
    %c0_0 = arith.constant 0 : index
    %0 = vector.load %arg1[%c0, %c0_0] : memref<16x32xf32, #tpu.memory_space<vmem>>, vector<16x32xf32>
    %cst = arith.constant 14.2857141 : f32
    %1 = vector.broadcast %cst : f32 to vector<16x32xf32>
    %2 = arith.mulf %0, %1 : vector<16x32xf32>
    %c0_1 = arith.constant 0 : index
    %c0_2 = arith.constant 0 : index
    %3 = vector.load %arg2[%c0_1, %c0_2] : memref<128x32xf32, #tpu.memory_space<vmem>>, vector<128x32xf32>
    %cst_3 = arith.constant dense<0.000000e+00> : vector<16x128xf32>
    %4 = tpu.matmul %2, %3, %cst_3 {dimension_numbers = #tpu.dot_dimension_numbers<[1], [1], [0], [0], [0, 0, 1, 0], [], []>} : vector<16x32xf32>, vector<128x32xf32>, vector<16x128xf32> -> vector<16x128xf32>
    %c16_i32 = arith.constant 16 : i32
    %5 = arith.muli %arg0, %c16_i32 : i32
    %6 = tpu.iota {dimensions = array<i32: 0>} : vector<16x1xi32>
    %7 = vector.broadcast %5 : i32 to vector<16x1xi32>
    %8 = arith.addi %7, %6 : vector<16x1xi32>
    %9 = tpu.iota {dimensions = array<i32: 1>} : vector<1x128xi32>
    %c16_i32_4 = arith.constant 16 : i32
    %10 = vector.broadcast %c16_i32_4 : i32 to vector<1x128xi32>
    %11 = arith.cmpi slt, %9, %10 : vector<1x128xi32>
    %12 = vector.broadcast %8 : vector<16x1xi32> to vector<16x128xi32>
    %13 = vector.broadcast %9 : vector<1x128xi32> to vector<16x128xi32>
    %14 = arith.cmpi ne, %12, %13 : vector<16x128xi32>
    %15 = vector.broadcast %11 : vector<1x128xi1> to vector<16x128xi1>
    %16 = arith.andi %15, %14 : vector<16x128xi1>
    %cst_5 = arith.constant 1.000000e+00 : f32
    %cst_6 = arith.constant 0.000000e+00 : f32
    %17 = vector.broadcast %cst_5 : f32 to vector<16x128xf32>
    %18 = vector.broadcast %cst_6 : f32 to vector<16x128xf32>
    %19 = arith.select %16, %17, %18 : vector<16x128xi1>, vector<16x128xf32>
    %cst_7 = arith.constant -1.000000e+30 : f32
    %20 = vector.shape_cast %11 : vector<1x128xi1> to vector<1x128xi1>
    %21 = vector.broadcast %20 : vector<1x128xi1> to vector<16x128xi1>
    %22 = vector.broadcast %cst_7 : f32 to vector<16x128xf32>
    %23 = arith.select %21, %4, %22 : vector<16x128xi1>, vector<16x128xf32>
    %cst_8 = arith.constant dense<0xFF800000> : vector<16xf32>
    %24 = vector.multi_reduction <maximumf>, %23, %cst_8 [1] : vector<16x128xf32> to vector<16xf32>
    %25 = vector.shape_cast %24 : vector<16xf32> to vector<16x1xf32>
    %26 = vector.broadcast %25 : vector<16x1xf32> to vector<16x128xf32>
    %27 = arith.subf %4, %26 : vector<16x128xf32>
    %28 = math.exp %27 : vector<16x128xf32>
    %29 = arith.mulf %28, %19 : vector<16x128xf32>
    %cst_9 = arith.constant dense<0.000000e+00> : vector<16xf32>
    %30 = vector.multi_reduction <add>, %29, %cst_9 [1] : vector<16x128xf32> to vector<16xf32>
    %31 = vector.shape_cast %30 : vector<16xf32> to vector<16x1xf32>
    %cst_10 = arith.constant 1.000000e-03 : f32
    %32 = vector.broadcast %cst_10 : f32 to vector<16x1xf32>
    %33 = arith.addf %31, %32 : vector<16x1xf32>
    %c0_11 = arith.constant 0 : index
    %c0_12 = arith.constant 0 : index
    %34 = vector.load %arg3[%c0_11, %c0_12] : memref<16x1xi32, #tpu.memory_space<vmem>>, vector<16x1xi32>
    %c0_13 = arith.constant 0 : index
    %c0_14 = arith.constant 0 : index
    %35 = vector.load %arg4[%c0_13, %c0_14] : memref<1x128xi32, #tpu.memory_space<vmem>>, vector<1x128xi32>
    %36 = vector.broadcast %34 : vector<16x1xi32> to vector<16x128xi32>
    %37 = vector.broadcast %35 : vector<1x128xi32> to vector<16x128xi32>
    %38 = arith.cmpi eq, %36, %37 : vector<16x128xi32>
    %cst_15 = arith.constant 1.000000e+00 : f32
    %cst_16 = arith.constant 0.000000e+00 : f32
    %39 = vector.broadcast %cst_15 : f32 to vector<16x128xf32>
    %40 = vector.broadcast %cst_16 : f32 to vector<16x128xf32>
    %41 = arith.select %38, %39, %40 : vector<16x128xi1>, vector<16x128xf32>
    %42 = arith.mulf %41, %19 : vector<16x128xf32>
    %cst_17 = arith.constant dense<0.000000e+00> : vector<16xf32>
    %43 = vector.multi_reduction <add>, %42, %cst_17 [1] : vector<16x128xf32> to vector<16xf32>
    %44 = vector.shape_cast %43 : vector<16xf32> to vector<16x1xf32>
    %45 = arith.mulf %42, %27 : vector<16x128xf32>
    %cst_18 = arith.constant dense<0.000000e+00> : vector<16xf32>
    %46 = vector.multi_reduction <add>, %45, %cst_18 [1] : vector<16x128xf32> to vector<16xf32>
    %47 = vector.shape_cast %46 : vector<16xf32> to vector<16x1xf32>
    %48 = math.log %33 : vector<16x1xf32>
    %49 = arith.mulf %44, %48 : vector<16x1xf32>
    %50 = arith.subf %47, %49 : vector<16x1xf32>
    %cst_19 = arith.constant 1.000000e-03 : f32
    %51 = vector.broadcast %cst_19 : f32 to vector<16x1xf32>
    %52 = arith.addf %44, %51 : vector<16x1xf32>
    %53 = arith.divf %50, %52 : vector<16x1xf32>
    %c16_i32_20 = arith.constant 16 : i32
    %54 = vector.broadcast %c16_i32_20 : i32 to vector<16x1xi32>
    %55 = arith.cmpi slt, %8, %54 : vector<16x1xi32>
    %cst_21 = arith.constant 0.000000e+00 : f32
    %56 = vector.broadcast %cst_21 : f32 to vector<16x1xf32>
    %57 = arith.select %55, %53, %56 : vector<16x1xi1>, vector<16x1xf32>
    %58 = vector.shape_cast %57 : vector<16x1xf32> to vector<1x16x1xf32>
    %cst_22 = arith.constant dense<0.000000e+00> : vector<1xf32>
    %59 = vector.multi_reduction <add>, %58, %cst_22 [1, 2] : vector<1x16x1xf32> to vector<1xf32>
    %60 = vector.shape_cast %59 : vector<1xf32> to vector<1x1x1xf32>
    %61 = vector.extract %60[0, 0, 0] : f32 from vector<1x1x1xf32>
    %62 = vector.broadcast %61 : f32 to vector<1x8x128xf32>
    %c0_23 = arith.constant 0 : index
    %c0_24 = arith.constant 0 : index
    %c0_25 = arith.constant 0 : index
    %63 = vector.load %arg5[%c0_23, %c0_24, %c0_25] : memref<1x8x128xf32, #tpu.memory_space<vmem>>, vector<1x8x128xf32>
    tpu.vector_store %arg5[%c0_23, %c0_24, %c0_25], %62 {strides = array<i32>} : memref<1x8x128xf32, #tpu.memory_space<vmem>>, vector<1x8x128xf32>,
    return
  }
  func.func @transform_0(%arg0: i32) -> (i32, i32) {
    %c0_i32 = arith.constant 0 : i32
    %c0_i32_0 = arith.constant 0 : i32
    return %arg0, %c0_i32 : i32, i32
  }
  func.func @transform_1(%arg0: i32) -> (i32, i32) {
    %c0_i32 = arith.constant 0 : i32
    %c0_i32_0 = arith.constant 0 : i32
    %c0_i32_1 = arith.constant 0 : i32
    return %c0_i32, %c0_i32_0 : i32, i32
  }
  func.func @transform_2(%arg0: i32) -> (i32, i32) {
    %c0_i32 = arith.constant 0 : i32
    %c0_i32_0 = arith.constant 0 : i32
    return %arg0, %c0_i32 : i32, i32
  }
  func.func @transform_3(%arg0: i32) -> (i32, i32) {
    %c0_i32 = arith.constant 0 : i32
    %c0_i32_0 = arith.constant 0 : i32
    %c0_i32_1 = arith.constant 0 : i32
    return %c0_i32, %c0_i32_0 : i32, i32
  }
  func.func @transform_4(%arg0: i32) -> (i32, i32, i32) {
    %c0_i32 = arith.constant 0 : i32
    %c0_i32_0 = arith.constant 0 : i32
    %c0_i32_1 = arith.constant 0 : i32
    return %arg0, %c0_i32, %c0_i32_0 : i32, i32, i32
  }
}

</mosaic_0001>

<bundles_post_ra>
// kernel: tpu_custom_call.1
= control target key start
LH: loop header
LB: loop body
LE: loop exit
PB: predicated region body
PF: predicated region fallthrough
CT: control target
= control target key end

     0   :  { %vm38_vm0 = vcmask 261120   ;;  %s473_s0 = inlined_call_operand.vmem [shape: f32[16,32], index: 0, kind: input, shape index: {}]   ;;  %s474_s1 = inlined_call_operand.vmem [shape: f32[128,32], index: 1, kind: input, shape index: {}]   ;;  %s475_s2 = inlined_call_operand.vmem [shape: s32[16,1], index: 2, kind: input, shape index: {}]   ;;  %s476_s3 = inlined_call_operand.vmem [shape: s32[1,128], index: 3, kind: input, shape index: {}]   ;;  %s477_s4 = inlined_call_operand.hbm [shape: f32[1,8,128], index: 4, kind: output, shape index: {}]  }
   0x1   :  { %v37_v0 = vld [vmem:[%s474_s1 + $0x78] sm:$0xff]  ;;  %v36_v1 = vld [vmem:[%s474_s1 + $0x70] sm:$0xff] }
   0x2   :  { %255 = vmatpush.xpose.msk.msra.mxu0 %vm38_vm0, %v37_v0  ;;  %273 = vmatpush.xpose.msk.msra.mxu1 %vm38_vm0, %v37_v0 }
   0x3   :  { %9 = vsyncpa [#allocation3], 0  ;;  %v35_v2 = vld [vmem:[%s474_s1 + $0x68] sm:$0xff]  ;;  %v34_v3 = vld [vmem:[%s474_s1 + $0x60] sm:$0xff]  ;;  %v335_v11 = vmov 0   ;;  %v117_v23 = vlaneseq  ;;  %v336_v29 = vmov 0.0  }
   0x4   :  { %v33_v4 = vld [vmem:[%s474_s1 + $0x58] sm:$0xff]  ;;  %v32_v5 = vld [vmem:[%s474_s1 + $0x50] sm:$0xff]  ;;  %v31_v6 = vld [vmem:[%s474_s1 + $0x48] sm:$0xff]  ;;  %294 = vset.pattern.permute.xlu1 %v335_v11  ;;  %295 = vset.pattern.permute.xlu0 %v335_v11  ;;  %s246_s5 = sshll.u32 %s477_s4, 4  ;;  %s247_s5 = int_to_ptr.hbm [resolvable:$true] %s246_s5 }
   0x5   :  { %v30_v7 = vld [vmem:[%s474_s1 + $0x40] sm:$0xff]  ;;  %v29_v8 = vld [vmem:[%s474_s1 + $0x38] sm:$0xff]  ;;  %v28_v10 = vld [vmem:[%s474_s1 + $0x30] sm:$0xff]  ;;  %v124_v24 = vand.u32 127, %v117_v23  ;;  %v118_v27 = vshrl.u32 %v117_v23, 7 }
   0x6   :  { %256 = vmatpush.xpose.msk.msra.mxu0 %vm38_vm0, %v36_v1  ;;  %274 = vmatpush.xpose.msk.msra.mxu1 %vm38_vm0, %v36_v1  ;;  %v154_v9 = vld [vmem:[%s475_s2] sm:$0xff]  ;;  %v27_v12 = vld [vmem:[%s474_s1 + $0x28] sm:$0xff]  ;;  %v25_v15 = vld [vmem:[%s474_s1 + $0x18] sm:$0xff] }
   0x7   :  { %158 = vperm.xlu1 %294, %v154_v9   ;;  %v155_v13 = vld [vmem:[%s475_s2 + $0x8] sm:$0xff]  ;;  %v26_v14 = vld [vmem:[%s474_s1 + $0x20] sm:$0xff]  ;;  %v24_v16 = vld [vmem:[%s474_s1 + $0x10] sm:$0xff]  ;;  %vm125_vm1 = vcmp.lt.s32.totalorder %v124_v24, 16  ;;  %vm126_vm3 = vcmp.ne.s32.totalorder %v118_v27, %v124_v24  ;;  %v119_v28 = vadd.s32 8, %v118_v27 }
   0x8   :  { %v23_v17 = vld [vmem:[%s474_s1 + $0x8] sm:$0xff]  ;;  %v18_v18 = vld [vmem:[%s473_s0] sm:$0xff]  ;;  %vm130_vm4 = vmand %vm125_vm1, %vm126_vm3 }
   0x9   :  { %v19_v19 = vld [vmem:[%s473_s0 + $0x8] sm:$0xff]  ;;  %v22_v20 = vld [vmem:[%s474_s1] sm:$0xff]  ;;  %v20_v21 = vmul.f32 14.285714, %v18_v18  ;;  %v132_v31 = vsel %vm130_vm4, 1.0, %v336_v29  ;;  %vm127_vm5 = vcmp.ne.s32.totalorder %v119_v28, %v124_v24  ;;  %s337_s0 = smov [#allocation2]  }
   0xa   :  { %257 = vmatpush.xpose.msk.msra.mxu0 %vm38_vm0, %v35_v2  ;;  %275 = vmatpush.xpose.msk.msra.mxu1 %vm38_vm0, %v35_v2  ;;  %v21_v22 = vmul.f32 14.285714, %v19_v19  ;;  %v296_v25 = vld [vmem:[%s476_s3] ss:$0 sm:$0xff]  ;;  %vm131_vm6 = vmand %vm125_vm1, %vm127_vm5  ;;  %s244_s1 = sshll.u32 %s337_s0, 4  ;;  %s245_s1 = int_to_ptr.vmem [resolvable:$true] %s244_s1 }
   0xb   :  { %v133_v34 = vsel %vm131_vm6, 1.0, %v336_v29 }
   0xe   :  { %258 = vmatpush.xpose.msk.msra.mxu0 %vm38_vm0, %v34_v3  ;;  %276 = vmatpush.xpose.msk.msra.mxu1 %vm38_vm0, %v34_v3 }
   0xf   :  { %161 = vperm.xlu1 %294, %v155_v13  }
  0x12   :  { %259 = vmatpush.xpose.msk.msra.mxu0 %vm38_vm0, %v33_v4  ;;  %277 = vmatpush.xpose.msk.msra.mxu1 %vm38_vm0, %v33_v4 }
  0x16   :  { %260 = vmatpush.xpose.msk.msra.mxu0 %vm38_vm0, %v32_v5  ;;  %278 = vmatpush.xpose.msk.msra.mxu1 %vm38_vm0, %v32_v5 }
  0x1a   :  { %261 = vmatpush.xpose.msk.msra.mxu0 %vm38_vm0, %v31_v6  ;;  %279 = vmatpush.xpose.msk.msra.mxu1 %vm38_vm0, %v31_v6 }
  0x1e   :  { %262 = vmatpush.xpose.msk.msra.mxu0 %vm38_vm0, %v30_v7  ;;  %280 = vmatpush.xpose.msk.msra.mxu1 %vm38_vm0, %v30_v7 }
  0x22   :  { %263 = vmatpush.xpose.msk.msra.mxu0 %vm38_vm0, %v29_v8  ;;  %281 = vmatpush.xpose.msk.msra.mxu1 %vm38_vm0, %v29_v8 }
  0x26   :  { %264 = vmatpush.xpose.msk.msra.mxu0 %vm38_vm0, %v28_v10  ;;  %282 = vmatpush.xpose.msk.msra.mxu1 %vm38_vm0, %v28_v10 }
  0x2a   :  { %265 = vmatpush.xpose.msk.msra.mxu0 %vm38_vm0, %v27_v12  ;;  %283 = vmatpush.xpose.msk.msra.mxu1 %vm38_vm0, %v27_v12 }
  0x2e   :  { %266 = vmatpush.xpose.msk.msra.mxu0 %vm38_vm0, %v26_v14  ;;  %284 = vmatpush.xpose.msk.msra.mxu1 %vm38_vm0, %v26_v14 }
  0x32   :  { %267 = vmatpush.xpose.msk.msra.mxu0 %vm38_vm0, %v25_v15  ;;  %285 = vmatpush.xpose.msk.msra.mxu1 %vm38_vm0, %v25_v15 }
  0x36   :  { %268 = vmatpush.xpose.msk.msra.mxu0 %vm38_vm0, %v24_v16  ;;  %286 = vmatpush.xpose.msk.msra.mxu1 %vm38_vm0, %v24_v16 }
  0x3a   :  { %269 = vmatpush.xpose.msk.msra.mxu0 %vm38_vm0, %v23_v17  ;;  %287 = vmatpush.xpose.msk.msra.mxu1 %vm38_vm0, %v23_v17 }
  0x3e   :  { %270 = vmatpush.xpose.msk.msra.mxu0 %vm38_vm0, %v22_v20  ;;  %288 = vmatpush.xpose.msk.msra.mxu1 %vm38_vm0, %v22_v20 }
  0x41   :  { %271 = vmatmul.msk.f32.vlgmr.msra.gmra.mxu0 %vm38_vm0, %v20_v21  ;;  %272 = vmatmul.msk.f32.vlgmr.msra.gmra.mxu1 %vm38_vm0, %v21_v22  ;;  %vm224_vm0 = vcmask 7168  }
  0x79   :  { %v159_v26 = vpop.permute.xlu1 %158 }
  0x7a   :  { %vm164_vm2 = vcmp.eq.s32.totalorder %v159_v26, %v296_v25 }
  0x7b   :  { %v166_v30 = vsel %vm164_vm2, 1.0, %v336_v29 }
  0x7c   :  { %v168_v32 = vmul.f32 %v166_v30, %v132_v31 }
  0x7e   :  { %170 = vadd.xlane.f32.xlu2 %v168_v32 }
  0x81   :  { %v162_v33 = vpop.permute.xlu1 %161 }
  0x82   :  { %vm165_vm7 = vcmp.eq.s32.totalorder %v162_v33, %v296_v25 }
  0x83   :  { %v167_v35 = vsel %vm165_vm7, 1.0, %v336_v29 }
  0x84   :  { %v169_v36 = vmul.f32 %v167_v35, %v133_v34 }
  0x86   :  { %172 = vadd.xlane.f32.xlu2 %v169_v36 }
  0xbe   :  { %v110_v37 = vpop.f32.mrf.mxu0  ;;  %v113_v39 = vpop.f32.mrf.mxu1 }
  0xbf   :  { %v134_v38 = vsel %vm125_vm1, %v110_v37, -1e+30  ;;  %v135_v40 = vsel %vm125_vm1, %v113_v39, -1e+30 }
  0xc0   :  { %136 = vmax.xlane.f32.xlu0 %v134_v38 }
  0xc8   :  { %138 = vmax.xlane.f32.xlu0 %v135_v40 }
  0xf1   :  { %v171_v53 = vpop.xlane.xlu2 %170 }
  0xf2   :  { %v188_v55 = vadd.f32 0.001, %v171_v53 }
  0xf4   :  { %vm195_vm8 = vweird.f32 %v188_v55  ;;  %v201_v7 = vand.u32 2147483648, %v188_v55  ;;  %v199_v10 = vand.u32 2147483647, %v188_v55 }
  0xf6   :  { %v202_v17 = vor.u32 1.1754944e-38, %v201_v7  ;;  %vm200_vm14 = vcmp.eq.f32.partialorder %v199_v10, 8.507059e+37 }
  0xf9   :  { %v173_v54 = vpop.xlane.xlu2 %172 }
  0xfa   :  { %v189_v56 = vadd.f32 0.001, %v173_v54 }
  0xfc   :  { %vm210_vm10 = vweird.f32 %v189_v56  ;;  %v216_v11 = vand.u32 2147483648, %v189_v56  ;;  %v214_v14 = vand.u32 2147483647, %v189_v56 }
  0xfe   :  { %v217_v21 = vor.u32 1.1754944e-38, %v216_v11  ;;  %vm215_vm15 = vcmp.eq.f32.partialorder %v214_v14, 8.507059e+37 }
 0x133   :  { %v137_v41 = vpop.xlane.xlu0 %136 }
 0x134   :  { %v140_v42 = vsub.f32 %v110_v37, %v137_v41 }
 0x136   :  { %v142_v43 = vmul.f32 1.442695, %v140_v42  ;;  %v174_v44 = vmul.f32 %v168_v32, %v140_v42 }
 0x138   :  { %297 = vpow2.f32 %v142_v43  ;;  %176 = vadd.xlane.f32.xlu2 %v174_v44 }
 0x13b   :  { %v139_v45 = vpop.xlane.xlu0 %138 }
 0x13c   :  { %v141_v46 = vsub.f32 %v113_v39, %v139_v45 }
 0x13e   :  { %v298_v47 = vpop.eup %297  ;;  %v144_v48 = vmul.f32 1.442695, %v141_v46  ;;  %v175_v51 = vmul.f32 %v169_v36, %v141_v46 }
 0x13f   :  { %v146_v49 = vmul.f32 %v298_v47, %v132_v31 }
 0x140   :  { %299 = vpow2.f32 %v144_v48 }
 0x141   :  { %148 = vadd.xlane.f32.xlu0 %v146_v49  ;;  %301 = vrcp.f32 %v188_v55 }
 0x142   :  { %303 = vrcp.f32 %v189_v56 }
 0x146   :  { %v300_v50 = vpop.eup %299 }
 0x147   :  { %v147_v52 = vmul.f32 %v300_v50, %v133_v34  ;;  %v302_v57 = vpop.eup %301 }
 0x148   :  { %v304_v59 = vpop.eup %303  ;;  %v191_v61 = vmul.f32 %v302_v57, %v188_v55  ;;  %vm196_vm9 = vweird.f32 %v302_v57 }
 0x149   :  { %178 = vadd.xlane.f32.xlu0 %v175_v51  ;;  %150 = vadd.xlane.f32.xlu1 %v147_v52  ;;  %v206_v62 = vmul.f32 %v304_v59, %v189_v56  ;;  %vm211_vm11 = vweird.f32 %v304_v59  ;;  %vm464_vm12 = vmor %vm195_vm8, %vm196_vm9 }
 0x14a   :  { %v192_v63 = vsub.f32 1.0, %v191_v61  ;;  %vm212_vm13 = vmor %vm210_vm10, %vm211_vm11 }
 0x14b   :  { %v207_v1 = vsub.f32 1.0, %v206_v62 }
 0x14c   :  { %v193_v5 = vmul.f32 %v302_v57, %v192_v63 }
 0x14d   :  { %v208_v6 = vmul.f32 %v304_v59, %v207_v1 }
 0x14e   :  { %v194_v9 = vadd.f32 %v302_v57, %v193_v5 }
 0x14f   :  { %v209_v13 = vadd.f32 %v304_v59, %v208_v6 }
 0x150   :  { %v198_v20 = vsel %vm464_vm12, %v302_v57, %v194_v9 }
 0x151   :  { %v213_v23 = vsel %vm212_vm13, %v304_v59, %v209_v13  ;;  %v203_v25 = vsel %vm200_vm14, %v202_v17, %v198_v20 }
 0x152   :  { %v218_v28 = vsel %vm215_vm15, %v217_v21, %v213_v23 }
 0x1ab   :  { %v177_v16 = vpop.xlane.xlu2 %176 }
 0x1b4   :  { %v149_v58 = vpop.xlane.xlu0 %148 }
 0x1b5   :  { %v152_v60 = vadd.f32 0.001, %v149_v58 }
 0x1b7   :  { %305 = vlog2.f32 %v152_v60 }
 0x1bc   :  { %v151_v0 = vpop.xlane.xlu1 %150  ;;  %v179_v24 = vpop.xlane.xlu0 %178 }
 0x1bd   :  { %v306_v2 = vpop.eup %305  ;;  %v153_v3 = vadd.f32 0.001, %v151_v0 }
 0x1be   :  { %v181_v4 = vmul.f32 0.6931472, %v306_v2 }
 0x1bf   :  { %307 = vlog2.f32 %v153_v3 }
 0x1c0   :  { %v184_v8 = vmul.f32 %v181_v4, %v171_v53 }
 0x1c2   :  { %v186_v19 = vsub.f32 %v177_v16, %v184_v8 }
 0x1c4   :  { %v204_v27 = vmul.f32 %v203_v25, %v186_v19 }
 0x1c5   :  { %v308_v15 = vpop.eup %307 }
 0x1c6   :  { %v183_v18 = vmul.f32 0.6931472, %v308_v15  ;;  %v225_v30 = vsel %vm224_vm0, %v204_v27, 0.0 }
 0x1c8   :  { %v185_v22 = vmul.f32 %v183_v18, %v173_v54 }
 0x1ca   :  { %v187_v26 = vsub.f32 %v179_v24, %v185_v22 }
 0x1cc   :  { %v219_v29 = vmul.f32 %v218_v28, %v187_v26 }
 0x1ce   :  { %v226_v31 = vsel %vm224_vm0, %v219_v29, 0.0 }
 0x1cf   :  { %v227_v32 = vadd.f32 %v226_v31, %v225_v30 }
 0x1d1   :  { %228 = vadd.xlane.f32.xlu2 %v227_v32 }
 0x244   :  { %v229_v33 = vpop.xlane.xlu2 %228 }
 0x245   :  { %v230_v34 = vrot.slane %v229_v33, 4 }
 0x247   :  { %v231_v35 = vadd.f32 %v230_v34, %v229_v33 }
 0x249   :  { %v232_v36 = vrot.slane %v231_v35, 2 }
 0x24b   :  { %v233_v37 = vadd.f32 %v232_v36, %v231_v35 }
 0x24d   :  { %v234_v38 = vrot.slane %v233_v37, 1 }
 0x24f   :  { %v235_v39 = vadd.f32 %v234_v38, %v233_v37 }
 0x251   :  { %289 = vpush %v235_v39 }
 0x282   :  { %s290_s6 = spop %289 }
 0x283   :  { %v237_v40 = vstv %s290_s6 }
 0x284   :  { %238 = vst [vmem:[#allocation2] sm:$0xff] %v237_v40 }
 0x285   :  { %249 = dma.vmem_to_hbm [thread:$0]  %s245_s1, 128, %s247_s5, [#allocation3]  }
 0x286   :  { %333 = dma.done.wait [#allocation3], 128  }
 0x287   :  { %334 = vsyncadd [#allocation3], 4294967168 }
 0x288   :  { %254 = vsyncpa [#allocation3], 1 }

</bundles_post_ra>
